<compile_context>
chip_gen: v6e
topology: v6e:2x2x1
jax: 0.10.0
libtpu: 0.0.40
codegen_flags: <defaults>
</compile_context>

<pallas_src>
import jax
import jax.numpy as jnp
from jax import lax
from jax.experimental import pallas as pl
from jax.experimental.pallas import tpu as pltpu

LANES = 128
CHUNK_ROWS = 32              # rows per inner-loop step == accumulator height
MAX_BLOCK_BYTES = 4 << 20    # per-input VMEM block (x2 inputs x2 buffers = 16 MiB)
VMEM_LIMIT_BYTES = 40 << 20


def _round_up(x, m):
    return ((x + m - 1) // m) * m


def _num_tensorcores():
    """Best-effort TensorCores-per-chip; defaults to 1 (correct for v5e/v6e)."""
    # TODO(synk): verify on v7x that the query reports 2 TCs and that
    # CORE_PARALLEL actually shards the leading grid axis across both cores.
    try:
        info = pltpu.get_tpu_info()
    except Exception:
        return 1
    for name in ("num_tensorcores", "tensorcores_per_chip", "tensor_cores_per_chip"):
        v = getattr(info, name, None)
        if isinstance(v, int) and v >= 1:
            return min(int(v), 2)
    return 1


def _make_kernel(block_rows, chunk_rows, nrows, steps, needs_mask,
                 compute_sq, compute_l1):
    n_chunks = block_rows // chunk_rows
    n_paths = int(compute_sq) + int(compute_l1)

    def kernel(o_ref, x_ref, part_ref):
        c = pl.program_id(0)   # core-parallel axis
        s = pl.program_id(1)   # reduction axis

        @pl.when(s == 0)
        def _():
            part_ref[...] = jnp.zeros_like(part_ref)

        blk = c * steps + s
        row0 = blk * block_rows   # first (unclamped) row covered by this block

        def accumulate(masked):
            def chunk_update(j, accs):
                r0 = j * chunk_rows
                if not isinstance(r0, int):
                    r0 = pl.multiple_of(r0, chunk_rows)
                o = o_ref[pl.ds(r0, chunk_rows), :].astype(jnp.float32)
                x = x_ref[pl.ds(r0, chunk_rows), :].astype(jnp.float32)
                d = o - x
                if masked:
                    rows = (row0 + r0 +
                            lax.broadcasted_iota(jnp.int32, (chunk_rows, LANES), 0))
                    d = jnp.where(rows < nrows, d, 0.0)
                new = []
                i = 0
                if compute_sq:
                    new.append(accs[i] + d * d)
                    i += 1
                if compute_l1:
                    new.append(accs[i] + jnp.abs(d))
                return tuple(new)

            zero = jnp.zeros((chunk_rows, LANES), jnp.float32)
            init = tuple(zero for _ in range(n_paths))
            if n_chunks == 1:
                accs = chunk_update(0, init)
            else:
                accs = lax.fori_loop(0, n_chunks, chunk_update, init,
                                     unroll=min(4, n_chunks))
            i = 0
            if compute_sq:
                part_ref[0, 0] += accs[i]
                i += 1
            if compute_l1:
                part_ref[0, 1] += accs[i]

        if needs_mask:
            # Only blocks whose row range crosses nrows pay the mask cost
            # (tail block of the data and phantom blocks of the core split).
            is_tail = row0 + block_rows > nrows

            @pl.when(jnp.logical_not(is_tail))
            def _():
                accumulate(masked=False)

            @pl.when(is_tail)
            def _():
                accumulate(masked=True)
        else:
            accumulate(masked=False)

    return kernel


def l1mse_loss(output, input, a=1.0, *,
               max_block_bytes=MAX_BLOCK_BYTES, ncores=None):
    """Pallas implementation of L1MSE.forward(output, input)."""
    assert output.shape == input.shape, "output/input must have the same shape"
    n = int(output.size)

    def prep(x):
        x = x.reshape(-1)   # keep original dtype: cast happens in-kernel
        rem = n % LANES
        if rem:
            # TODO(synk): ragged-lane tail pays one padded copy; lane-aligned
            # sizes (the common case) take the copy-free path.
            x = jnp.pad(x, (0, LANES - rem))
        return x.reshape(-1, LANES)

    o2d = prep(output)
    i2d = prep(input)
    nrows = o2d.shape[0]

    itemsizes = (output.dtype.itemsize, input.dtype.itemsize)
    # Sublane packing: f32 -> 8 rows/vreg, bf16 -> 16, int8/fp8 -> 32.
    row_align = max(8, 32 // min(itemsizes))
    # Byte-sized block cap (largest itemsize bounds the per-block VMEM bytes).
    rows_cap = max(CHUNK_ROWS,
                   (max_block_bytes // (LANES * max(itemsizes))
                    // CHUNK_ROWS) * CHUNK_ROWS)

    aligned_rows = _round_up(nrows, row_align)
    if aligned_rows <= CHUNK_ROWS:
        # Whole problem fits in a single inner chunk; no loop needed.
        block_rows = aligned_rows
        chunk_rows = block_rows
    else:
        chunk_rows = CHUNK_ROWS
        block_rows = min(rows_cap, _round_up(nrows, chunk_rows))

    num_blocks = pl.cdiv(nrows, block_rows)

    detected = _num_tensorcores()
    if ncores is None:
        ncores = detected
    ncores = max(1, min(int(ncores), num_blocks))
    steps = pl.cdiv(num_blocks, ncores)
    needs_mask = (ncores * steps * block_rows != nrows)

    compute_sq, compute_l1 = True, True
    if isinstance(a, (int, float)):
        if float(a) == 1.0:
            compute_l1 = False
        if float(a) == 0.0:
            compute_sq = False

    def in_map(c, s):
        blk = c * steps + s
        # Phantom blocks of the last per-core chunk are clamped to a valid
        # block; their contribution is fully masked inside the kernel.
        return (jnp.minimum(blk, num_blocks - 1), 0)

    acc_rows = chunk_rows
    kernel = _make_kernel(block_rows, chunk_rows, nrows, steps, needs_mask,
                          compute_sq, compute_l1)

    if ncores > 1 and detected >= ncores:
        core_sem = getattr(pltpu, "CORE_PARALLEL", "parallel")
    elif ncores > 1:
        core_sem = "parallel"
    else:
        core_sem = "arbitrary"

    partials = pl.pallas_call(
        kernel,
        out_shape=jax.ShapeDtypeStruct((ncores, 2, acc_rows, LANES), jnp.float32),
        grid_spec=pltpu.PrefetchScalarGridSpec(
            num_scalar_prefetch=0,
            grid=(ncores, steps),
            in_specs=[
                pl.BlockSpec((block_rows, LANES), in_map),
                pl.BlockSpec((block_rows, LANES), in_map),
            ],
            # Output block depends only on the core axis -> resident
            # accumulator across the reduction axis, one writeback per core.
            out_specs=pl.BlockSpec((1, 2, acc_rows, LANES),
                                   lambda c, s: (c, 0, 0, 0)),
        ),
        compiler_params=pltpu.CompilerParams(
            dimension_semantics=(core_sem, "arbitrary"),
            vmem_limit_bytes=VMEM_LIMIT_BYTES),
    )(o2d, i2d)

    denom = float(n)
    mse = jnp.sum(partials[:, 0]) / denom
    l1 = jnp.sum(partials[:, 1]) / denom
    # Statically skipped paths leave their partials zero, so this is exact.
    loss = a * mse + (1.0 - a) * l1
    return loss   # .mean() of a scalar is the scalar itself


if __name__ == "__main__":
    key = jax.random.PRNGKey(0)

    def ref_loss(o, x, a):
        d = o.astype(jnp.float32) - x.astype(jnp.float32)
        return a * jnp.mean(d * d) + (1.0 - a) * jnp.mean(jnp.abs(d))

    # (shape, dtype, a, kwargs)
    cases = [
        ((2, 4, 16, 16), jnp.float32, 1.0, {}),            # module default a=1 (MSE only)
        ((2, 4, 16, 16), jnp.float32, 0.3, {}),            # mixed L1/MSE
        ((2, 4, 16, 16), jnp.float32, 0.0, {}),            # L1-only static path
        ((2, 4, 16, 16), jnp.bfloat16, 0.5, {}),           # in-kernel upcast
        ((2, 3, 16, 16), jnp.float32, 0.5, {}),            # masked partial (single chunk)
        ((4, 64, 128), jnp.float32, 0.7, {}),              # unmasked multi-chunk fori_loop
        ((4, 50, 128), jnp.float32, 0.6, {}),              # masked tail + multi-chunk loop
        ((2, 100, 128), jnp.float32, 0.25,                 # multi-block grid, forced 2-core
         dict(max_block_bytes=32 * 128 * 4, ncores=2)),    # split + phantom-block clamp
        ((5, 7, 9), jnp.float32, 0.25, {}),                # ragged lane tail
    ]

    for idx, (shape, dtype, a, kw) in enumerate(cases):
        k1, k2 = jax.random.split(jax.random.fold_in(key, idx))
        o = jax.random.normal(k1, shape, dtype=jnp.float32).astype(dtype)
        x = jax.random.normal(k2, shape, dtype=jnp.float32).astype(dtype)
        got = jax.block_until_ready(l1mse_loss(o, x, a=a, **kw))
        want = ref_loss(o, x, a)
        assert jnp.allclose(got, want, rtol=1e-5, atol=1e-6), (shape, a, got, want)

    print("KERNEL_OK")
</pallas_src>

<mosaic_0001>
module attributes {stable_mosaic.version = 11 : i64} {
  func.func @kernel(%arg0: i32, %arg1: i32, %arg2: memref<16x128xf32, #tpu.memory_space<vmem>>, %arg3: memref<16x128xf32, #tpu.memory_space<vmem>>, %arg4: memref<1x2x16x128xf32, #tpu.memory_space<vmem>>) attributes {dimension_semantics = [#tpu.dimension_semantics<arbitrary>, #tpu.dimension_semantics<arbitrary>], iteration_bounds = array<i64: 1, 1>, scalar_prefetch = 0 : i64, scratch_operands = 0 : i64, tpu.core_type = #tpu.core_type<tc>, window_params = [{transform_indices = @transform_0, window_bounds = array<i64: 16, 128>}, {transform_indices = @transform_1, window_bounds = array<i64: 16, 128>}, {transform_indices = @transform_2, window_bounds = array<i64: 1, 2, 16, 128>}]} {
    %c0_i32 = arith.constant 0 : i32
    %0 = arith.cmpi eq, %arg1, %c0_i32 : i32
    %1 = arith.extui %0 : i1 to i32
    %c0_i32_0 = arith.constant 0 : i32
    %2 = arith.cmpi ne, %1, %c0_i32_0 : i32
    scf.if %2 {
      %cst_12 = arith.constant 0.000000e+00 : f32
      %15 = vector.broadcast %cst_12 : f32 to vector<1x2x16x128xf32>
      %c0_13 = arith.constant 0 : index
      %c0_14 = arith.constant 0 : index
      %c0_15 = arith.constant 0 : index
      %c0_16 = arith.constant 0 : index
      %16 = vector.load %arg4[%c0_13, %c0_14, %c0_15, %c0_16] : memref<1x2x16x128xf32, #tpu.memory_space<vmem>>, vector<1x2x16x128xf32>
      tpu.vector_store %arg4[%c0_13, %c0_14, %c0_15, %c0_16], %15 {strides = array<i32>} : memref<1x2x16x128xf32, #tpu.memory_space<vmem>>, vector<1x2x16x128xf32>,
    } else {
    }
    %cst = arith.constant 0.000000e+00 : f32
    %3 = vector.broadcast %cst : f32 to vector<16x128xf32>
    %c0 = arith.constant 0 : index
    %c0_1 = arith.constant 0 : index
    %4 = vector.load %arg2[%c0, %c0_1] : memref<16x128xf32, #tpu.memory_space<vmem>>, vector<16x128xf32>
    %c0_2 = arith.constant 0 : index
    %c0_3 = arith.constant 0 : index
    %5 = vector.load %arg3[%c0_2, %c0_3] : memref<16x128xf32, #tpu.memory_space<vmem>>, vector<16x128xf32>
    %6 = arith.subf %4, %5 : vector<16x128xf32>
    %7 = arith.mulf %6, %6 : vector<16x128xf32>
    %8 = arith.addf %3, %7 : vector<16x128xf32>
    %c0_4 = arith.constant 0 : index
    %c0_5 = arith.constant 0 : index
    %c0_6 = arith.constant 0 : index
    %c0_7 = arith.constant 0 : index
    %9 = vector.load %arg4[%c0_4, %c0_5, %c0_6, %c0_7] : memref<1x2x16x128xf32, #tpu.memory_space<vmem>>, vector<1x1x16x128xf32>
    %10 = vector.shape_cast %9 : vector<1x1x16x128xf32> to vector<16x128xf32>
    %11 = arith.addf %10, %8 : vector<16x128xf32>
    %c0_8 = arith.constant 0 : index
    %c0_9 = arith.constant 0 : index
    %c0_10 = arith.constant 0 : index
    %c0_11 = arith.constant 0 : index
    %12 = vector.load %arg4[%c0_8, %c0_9, %c0_10, %c0_11] : memref<1x2x16x128xf32, #tpu.memory_space<vmem>>, vector<1x1x16x128xf32>
    %13 = vector.shape_cast %12 : vector<1x1x16x128xf32> to vector<16x128xf32>
    %14 = vector.shape_cast %11 : vector<16x128xf32> to vector<1x1x16x128xf32>
    tpu.vector_store %arg4[%c0_8, %c0_9, %c0_10, %c0_11], %14 {strides = array<i32>} : memref<1x2x16x128xf32, #tpu.memory_space<vmem>>, vector<1x1x16x128xf32>,
    return
  }
  func.func @transform_0(%arg0: i32, %arg1: i32) -> (i32, i32) {
    %c1_i32 = arith.constant 1 : i32
    %0 = arith.muli %arg0, %c1_i32 : i32
    %1 = arith.addi %0, %arg1 : i32
    %c0_i32 = arith.constant 0 : i32
    %2 = arith.minsi %1, %c0_i32 : i32
    %c0_i32_0 = arith.constant 0 : i32
    %c0_i32_1 = arith.constant 0 : i32
    return %2, %c0_i32_0 : i32, i32
  }
  func.func @transform_1(%arg0: i32, %arg1: i32) -> (i32, i32) {
    %c1_i32 = arith.constant 1 : i32
    %0 = arith.muli %arg0, %c1_i32 : i32
    %1 = arith.addi %0, %arg1 : i32
    %c0_i32 = arith.constant 0 : i32
    %2 = arith.minsi %1, %c0_i32 : i32
    %c0_i32_0 = arith.constant 0 : i32
    %c0_i32_1 = arith.constant 0 : i32
    return %2, %c0_i32_0 : i32, i32
  }
  func.func @transform_2(%arg0: i32, %arg1: i32) -> (i32, i32, i32, i32) {
    %c0_i32 = arith.constant 0 : i32
    %c0_i32_0 = arith.constant 0 : i32
    %c0_i32_1 = arith.constant 0 : i32
    %c0_i32_2 = arith.constant 0 : i32
    return %arg0, %c0_i32, %c0_i32_0, %c0_i32_1 : i32, i32, i32, i32
  }
}

</mosaic_0001>

<bundles_post_ra>
// kernel: tpu_custom_call.1
= control target key start
LH: loop header
LB: loop body
LE: loop exit
PB: predicated region body
PF: predicated region fallthrough
CT: control target
= control target key end

     0   :  { %7 = vsyncpa [#allocation3], 0  ;;  %s217_s0 = inlined_call_operand.hbm [shape: f32[16,128], index: 0, kind: input, shape index: {}]   ;;  %s218_s1 = inlined_call_operand.hbm [shape: f32[16,128], index: 1, kind: input, shape index: {}]   ;;  %s219_s2 = inlined_call_operand.hbm [shape: f32[1,2,16,128], index: 2, kind: output, shape index: {}]  }
   0x1   :  { %8 = vsyncpa [#allocation6], 0 }
   0x2   :  { %9 = vsyncpa [#allocation4], 0  ;;  %s178_s9 = smov [#allocation2]  }
   0x3   :  { %s21_s10 = sshll.u32 %s178_s9, 4  ;;  %s22_s10 = int_to_ptr.vmem [resolvable:$true] %s21_s10 }
   0x4   :  { %s120_s11 = scalar_lea.vmem %s22_s10, 256  ;;  %p125_p1 = scmp.lt.s32.totalorder %s22_s10, %s22_s10 }
   0x5   :  { %p121_p0 = scmp.ne.s32.totalorder %s22_s10, %s120_s11  ;;  %p126_p2 = scmp.lt.s32.totalorder %s120_s11, %s120_s11 }
   0x7   :  { %p127_p3 = por %p126_p2, %p125_p1 }
   0x9   :  { %p128_p4 = pnand %p127_p3, %p121_p0 }
   0xb   :  { %131 = shalt.err (!%p128_p4)
}
   0xc   :  { %s179_s12 = smov 128   ;;  %s180_s13 = smov 8  }
   0xd   :  { %27 = dma.hbm_to_vmem [thread:$0]  %s217_s0, 256, %s22_s10, [#allocation3], %s179_s12, %s179_s12, %s180_s13  }
   0xe   :  { %s181_s16 = smov [#allocation5]  }
   0xf   :  { %s39_s17 = sshll.u32 %s181_s16, 4  ;;  %s40_s17 = int_to_ptr.vmem [resolvable:$true] %s39_s17 }
  0x10   :  { %s140_s18 = scalar_lea.vmem %s40_s17, 256  ;;  %p145_p6 = scmp.lt.s32.totalorder %s40_s17, %s40_s17 }
  0x11   :  { %p141_p5 = scmp.ne.s32.totalorder %s40_s17, %s140_s18  ;;  %p146_p7 = scmp.lt.s32.totalorder %s140_s18, %s140_s18 }
  0x13   :  { %p147_p8 = por %p146_p7, %p145_p6 }
  0x15   :  { %p148_p9 = pnand %p147_p8, %p141_p5 }
  0x17   :  { %151 = shalt.err (!%p148_p9)
}
  0x18   :  { %45 = dma.hbm_to_vmem [thread:$0]  %s218_s1, 256, %s40_s17, [#allocation6], %s179_s12, %s179_s12, %s180_s13  }
  0x19   :  { %172 = dma.done.wait [#allocation3], 256  }
  0x1a   :  { %173 = vsyncadd [#allocation3], 4294967040 }
  0x1b   :  { %174 = dma.done.wait [#allocation6], 256  }
  0x1c   :  { %175 = vsyncadd [#allocation6], 4294967040  ;;  %v182_v0 = vmov 0.0   ;;  %v68_v1 = vld [vmem:[#allocation2] sm:$0xff]  ;;  %v70_v2 = vld [vmem:[#allocation5] sm:$0xff]  ;;  %s183_s0 = smov [#allocation7]  }
  0x1d   :  { %66 = vst [vmem:[#allocation7 + $0x10] sm:$0xff] %v182_v0  ;;  %67 = vst [vmem:[#allocation7 + $0x18] sm:$0xff] %v182_v0  ;;  %v69_v3 = vld [vmem:[#allocation2 + $0x8] sm:$0xff]  ;;  %v72_v4 = vsub.f32 %v68_v1, %v70_v2  ;;  %v71_v5 = vld [vmem:[#allocation5 + $0x8] sm:$0xff]  ;;  %s89_s21 = sshll.u32 %s183_s0, 4  ;;  %s90_s21 = int_to_ptr.vmem [resolvable:$true] %s89_s21 }
  0x1e   :  { %v73_v6 = vsub.f32 %v69_v3, %v71_v5  ;;  %s152_s1 = scalar_lea.vmem %s90_s21, 512  ;;  %p157_p11 = scmp.lt.s32.totalorder %s90_s21, %s90_s21 }
  0x1f   :  { %v74_v7 = vmul.f32 %v72_v4, %v72_v4  ;;  %p153_p10 = scmp.ne.s32.totalorder %s90_s21, %s152_s1  ;;  %p158_p12 = scmp.lt.s32.totalorder %s152_s1, %s152_s1 }
  0x20   :  { %v75_v8 = vmul.f32 %v73_v6, %v73_v6 }
  0x21   :  { %82 = vst [vmem:[#allocation7] sm:$0xff] %v74_v7  ;;  %p159_p13 = por %p158_p12, %p157_p11 }
  0x22   :  { %83 = vst [vmem:[#allocation7 + $0x8] sm:$0xff] %v75_v8 }
  0x23   :  { %p160_p0 = pnand %p159_p13, %p153_p10 }
  0x25   :  { %163 = shalt.err (!%p160_p0)
}
  0x26   :  { %95 = dma.vmem_to_hbm [thread:$0]  %s90_s21, 512, %s219_s2, [#allocation4], %s179_s12, %s179_s12, %s180_s13  }
  0x27   :  { %176 = dma.done.wait [#allocation4], 512  }
  0x28   :  { %177 = vsyncadd [#allocation4], 4294966784 }
  0x29   :  { %99 = vsyncpa [#allocation3], 1 }
  0x2a   :  { %100 = vsyncpa [#allocation6], 1 }
  0x2b   :  { %101 = vsyncpa [#allocation4], 1 }

</bundles_post_ra>
